<compile_context>
chip_gen: v6e
topology: v6e:2x2x1
jax: 0.10.0
libtpu: 0.0.40
codegen_flags: <defaults>
</compile_context>

<pallas_src>
import functools
import math

import jax
import jax.numpy as jnp
from jax import lax
from jax.experimental import pallas as pl
from jax.experimental.pallas import tpu as pltpu

EPS = 1e-4


# ----------------------------------------------------------------------------
# Wrapper-side (plain JAX) helpers: EDM2 normalize + effective MPLinear weight.
# ----------------------------------------------------------------------------
def _normalize(x, axis=-1, eps=EPS):
    """EDM2-style normalize: unit per-element RMS along `axis` (exact math)."""
    n = jnp.sqrt(jnp.sum(jnp.square(x), axis=axis, keepdims=True))
    n = eps + n / math.sqrt(x.shape[axis])
    return x / n


def _mp_weight(w):
    """MPLinear effective weight: normalized rows scaled by 1/sqrt(fan_in)."""
    fan_in = w.shape[-1]
    return _normalize(w.astype(jnp.float32), axis=-1) / math.sqrt(fan_in)


# ----------------------------------------------------------------------------
# In-kernel helpers.
# ----------------------------------------------------------------------------
def _normalize_in_kernel(x, eps=EPS):
    """Exact normalize along the last axis (x is f32). Amortized -> exact."""
    ss = jnp.sum(x * x, axis=-1, keepdims=True)
    denom = eps + jnp.sqrt(ss) * (1.0 / math.sqrt(x.shape[-1]))
    return x / denom


def _split_heads(x2d, num_heads, head_dim, offset=0):
    """(T, ...) -> (H, T, hd) via static lane slices + a major-axis stack."""
    return jnp.stack(
        [x2d[:, offset + h * head_dim:offset + (h + 1) * head_dim]
         for h in range(num_heads)],
        axis=0)


def _merge_heads(x3d):
    """(H, T, hd) -> (T, H*hd) via a lane-axis concat."""
    return jnp.concatenate([x3d[h] for h in range(x3d.shape[0])], axis=-1)


# ----------------------------------------------------------------------------
# Pre-pass kernel: kv projection + k normalization, written head-major to HBM.
# Runs once per (b, kv-tile) -> no redundancy across q tiles.
# ----------------------------------------------------------------------------
def kv_project_kernel(xkv_ref, wkv_ref, kn_ref, v_ref, *, num_heads, head_dim):
    D = num_heads * head_dim
    kv2d = jnp.dot(xkv_ref[...], wkv_ref[...],
                   preferred_element_type=jnp.float32)          # (tk, 2D) f32
    kh = _split_heads(kv2d, num_heads, head_dim, offset=0)      # (H, tk, hd)
    vh = _split_heads(kv2d, num_heads, head_dim, offset=D)      # (H, tk, hd)
    kn_ref[...] = _normalize_in_kernel(kh).astype(kn_ref.dtype)
    v_ref[...] = vh.astype(v_ref.dtype)


# ----------------------------------------------------------------------------
# Flash kernel: q projection + normalization (once per q tile), online softmax
# over kv tiles, output projection in the finalize phase.
# ----------------------------------------------------------------------------
def flash_attention_kernel(xq_ref, kn_ref, v_ref, wq_ref, wout_ref, o_ref,
                           q_scr, m_scr, l_scr, acc_scr,
                           *, num_heads, head_dim, scale, seq_len, block_k,
                           mask_keys, bf16_exp):
    ki = pl.program_id(2)
    n_kv = pl.num_programs(2)
    cdt = xq_ref.dtype  # MXU compute dtype (input dtype; f32 accumulation)

    # ---- init (first kv tile of this (b, q-tile)): project + normalize q ----
    @pl.when(ki == 0)
    def _init():
        q2d = jnp.dot(xq_ref[...], wq_ref[...],
                      preferred_element_type=jnp.float32)        # (tq, D) f32
        qh = _split_heads(q2d, num_heads, head_dim)               # (H, tq, hd)
        # Fold the softmax scale into q here (after the scale-invariant
        # normalization) so no per-kv-step score scaling is needed.
        q_scr[...] = (_normalize_in_kernel(qh) * scale).astype(q_scr.dtype)
        m_scr[...] = jnp.full(m_scr.shape, -jnp.inf, dtype=m_scr.dtype)
        l_scr[...] = jnp.zeros(l_scr.shape, dtype=l_scr.dtype)
        acc_scr[...] = jnp.zeros(acc_scr.shape, dtype=acc_scr.dtype)

    # ---- batched (over heads) scores + online softmax ----
    s = jnp.einsum('hqd,hkd->hqk', q_scr[...], kn_ref[...],
                   preferred_element_type=jnp.float32)            # (H, tq, tk)
    if mask_keys:
        kpos = ki * block_k + lax.broadcasted_iota(jnp.int32, (1, 1, block_k), 2)
        s = jnp.where(kpos < seq_len, s, -jnp.inf)

    m_prev = m_scr[...]                                           # (H, tq, 1)
    m_new = jnp.maximum(m_prev, jnp.max(s, axis=-1, keepdims=True))
    alpha = jnp.exp(m_prev - m_new)                               # (H, tq, 1)
    if bf16_exp:
        # bf16 EUP path (v6e/v7x, bf16 inputs): p is consumed by a bf16 matmul
        # anyway; m/l/alpha stay f32, l is accumulated in f32.
        p = jnp.exp((s - m_new).astype(jnp.bfloat16))             # (H, tq, tk)
        p_sum = jnp.sum(p.astype(jnp.float32), axis=-1, keepdims=True)
    else:
        p = jnp.exp(s - m_new)
        p_sum = jnp.sum(p, axis=-1, keepdims=True)
    l_scr[...] = alpha * l_scr[...] + p_sum
    acc_scr[...] = alpha * acc_scr[...] + jnp.einsum(
        'hqk,hkd->hqd', p.astype(cdt), v_ref[...],
        preferred_element_type=jnp.float32)                       # (H, tq, hd)
    m_scr[...] = m_new

    # ---- finalize: exact 1/l rescale, merge heads, output projection ----
    @pl.when(ki == n_kv - 1)
    def _finalize():
        inv_l = pl.reciprocal(l_scr[...], approx=False)           # exact, once/tile
        attn2d = _merge_heads(acc_scr[...] * inv_l).astype(cdt)   # (tq, D)
        out = jnp.dot(attn2d, wout_ref[...],
                      preferred_element_type=jnp.float32)         # (tq, D)
        o_ref[...] = out.astype(o_ref.dtype)


# ----------------------------------------------------------------------------
# Wrapper.
# ----------------------------------------------------------------------------
def _round_up(x, m):
    return ((x + m - 1) // m) * m


def _tpu_defaults():
    """Generation-aware tiles / VMEM limit / EUP-bf16 availability."""
    kind = ""
    try:
        kind = jax.devices()[0].device_kind.lower()
    except Exception:
        pass
    if "v7" in kind:   # 64 MiB VMEM/TC -> small q tiles, conservative limit
        return dict(tk=256, tq_max=256, vmem=56 * 1024 * 1024, bf16_eup=True)
    if "v6" in kind:   # 128 MiB VMEM -> big q tiles
        return dict(tk=256, tq_max=1024, vmem=100 * 1024 * 1024, bf16_eup=True)
    if "v5" in kind:   # 128x128 MXU, no bf16 VPU/EUP -> tk=128
        return dict(tk=128, tq_max=512, vmem=96 * 1024 * 1024, bf16_eup=False)
    return dict(tk=256, tq_max=512, vmem=64 * 1024 * 1024, bf16_eup=False)


def _choose_tiles(T, tk, tq_max):
    """Returns (T_pad, tq, tk). T is padded (and keys masked) when needed."""
    if T <= tk:
        t = _round_up(T, 8)
        return t, t, t
    T_pad = _round_up(T, tk)
    for tq in (1024, 512, 256, 128):
        if tq <= tq_max and T_pad % tq == 0:
            return T_pad, tq, tk
    return T_pad, tk, tk


def attention_forward(x, wqkv, wout, num_heads):
    """x: (...B, T, D) -> (...B, T, D)."""
    *batch, T, D = x.shape
    assert D % num_heads == 0
    head_dim = D // num_heads
    scale = 1.0 / math.sqrt(head_dim)

    xb = x.reshape(-1, T, D)
    B = xb.shape[0]

    cfg = _tpu_defaults()
    T_pad, tq, tk = _choose_tiles(T, cfg["tk"], cfg["tq_max"])
    nq, nk = T_pad // tq, T_pad // tk
    mask_keys = (T_pad != T)
    use_bf16_exp = cfg["bf16_eup"] and x.dtype == jnp.bfloat16

    if mask_keys:
        xb = jnp.pad(xb, ((0, 0), (0, T_pad - T), (0, 0)))

    # Normalize + pre-transpose weights once (layout plumbing outside kernel);
    # keep them in the kernel compute dtype so nothing is re-cast per step.
    wqkv_n = _mp_weight(wqkv)                                # f32 (3D, D)
    wout_n = _mp_weight(wout)                                # f32 (D, D)
    wq_t = jnp.transpose(wqkv_n[:D]).astype(x.dtype)         # (D, D)
    wkv_t = jnp.transpose(wqkv_n[D:]).astype(x.dtype)        # (D, 2D)
    wout_t = jnp.transpose(wout_n).astype(x.dtype)           # (D, D)

    cparams_pre = pltpu.CompilerParams(
        dimension_semantics=("parallel", "parallel"),
        vmem_limit_bytes=cfg["vmem"])
    cparams_flash = pltpu.CompilerParams(
        dimension_semantics=("parallel", "parallel", "arbitrary"),
        vmem_limit_bytes=cfg["vmem"])

    def _weight_spec(shape, single_buffer):
        nblk = len(shape)
        if single_buffer:
            # Constant index map -> double buffering is pure VMEM waste.
            return pl.BlockSpec(shape, lambda *_: (0,) * nblk,
                                pipeline_mode=pl.Buffered(1))
        return pl.BlockSpec(shape, lambda *_: (0,) * nblk)

    def _run(single_buffer_weights):
        # ---- pre-pass: project k/v once, normalize k, store head-major ----
        kv_kern = functools.partial(kv_project_kernel, num_heads=num_heads,
                                    head_dim=head_dim)
        kn, v = pl.pallas_call(
            kv_kern,
            out_shape=(
                jax.ShapeDtypeStruct((B, num_heads, T_pad, head_dim), x.dtype),
                jax.ShapeDtypeStruct((B, num_heads, T_pad, head_dim), x.dtype),
            ),
            grid_spec=pltpu.PrefetchScalarGridSpec(
                num_scalar_prefetch=0,
                grid=(B, nk),
                in_specs=[
                    pl.BlockSpec((pl.Squeezed(), tk, D),
                                 lambda b, ki: (b, ki, 0)),
                    _weight_spec((D, 2 * D), single_buffer_weights),   # Wkv^T
                ],
                out_specs=(
                    pl.BlockSpec((pl.Squeezed(), num_heads, tk, head_dim),
                                 lambda b, ki: (b, 0, ki, 0)),
                    pl.BlockSpec((pl.Squeezed(), num_heads, tk, head_dim),
                                 lambda b, ki: (b, 0, ki, 0)),
                ),
            ),
            compiler_params=cparams_pre,
        )(xb, wkv_t)

        # ---- flash attention over (B, q-tiles, kv-tiles) ----
        flash_kern = functools.partial(
            flash_attention_kernel, num_heads=num_heads, head_dim=head_dim,
            scale=scale, seq_len=T, block_k=tk,
            mask_keys=mask_keys, bf16_exp=use_bf16_exp)
        out = pl.pallas_call(
            flash_kern,
            out_shape=jax.ShapeDtypeStruct((B, T_pad, D), x.dtype),
            grid_spec=pltpu.PrefetchScalarGridSpec(
                num_scalar_prefetch=0,
                grid=(B, nq, nk),
                in_specs=[
                    # x for the q tile (constant over the kv axis).
                    pl.BlockSpec((pl.Squeezed(), tq, D),
                                 lambda b, qi, ki: (b, qi, 0)),
                    # head-major normalized k and v for the kv tile.
                    pl.BlockSpec((pl.Squeezed(), num_heads, tk, head_dim),
                                 lambda b, qi, ki: (b, 0, ki, 0)),
                    pl.BlockSpec((pl.Squeezed(), num_heads, tk, head_dim),
                                 lambda b, qi, ki: (b, 0, ki, 0)),
                    # Resident, pre-transposed, single-buffered weights.
                    _weight_spec((D, D), single_buffer_weights),       # Wq^T
                    _weight_spec((D, D), single_buffer_weights),       # Wout^T
                ],
                out_specs=pl.BlockSpec((pl.Squeezed(), tq, D),
                                       lambda b, qi, ki: (b, qi, 0)),
                scratch_shapes=[
                    pltpu.VMEM((num_heads, tq, head_dim), x.dtype),      # q*scale
                    pltpu.VMEM((num_heads, tq, 1), jnp.float32),         # m
                    pltpu.VMEM((num_heads, tq, 1), jnp.float32),         # l
                    pltpu.VMEM((num_heads, tq, head_dim), jnp.float32),  # acc
                ],
            ),
            compiler_params=cparams_flash,
        )(xb, kn, v, wq_t, wout_t)
        return jax.block_until_ready(out)

    try:
        out = _run(single_buffer_weights=True)
    except Exception:
        # Fallback if this jax build rejects pipeline_mode=pl.Buffered(1).
        out = _run(single_buffer_weights=False)

    out = out[:, :T, :]
    return out.reshape(*batch, T, D)


# ----------------------------------------------------------------------------
# Pure-JAX reference mirroring the PyTorch forward (HIGHEST-precision matmuls).
# ----------------------------------------------------------------------------
def attention_reference(x, wqkv, wout, num_heads):
    P = jax.lax.Precision.HIGHEST
    *batch, T, D = x.shape
    head_dim = D // num_heads
    scale = 1.0 / math.sqrt(head_dim)
    xf = x.astype(jnp.float32).reshape(-1, T, D)

    wqkv_n = _mp_weight(wqkv)
    wout_n = _mp_weight(wout)

    qkv = jnp.einsum('btd,ed->bte', xf, wqkv_n, precision=P)   # (B, T, 3D)
    q, k, v = jnp.split(qkv, 3, axis=-1)

    def to_heads(t):
        return t.reshape(-1, T, num_heads, head_dim).transpose(0, 2, 1, 3)

    q, k, v = to_heads(q), to_heads(k), to_heads(v)             # (B, H, T, hd)
    q = _normalize(q)
    k = _normalize(k)
    s = jnp.einsum('bhqd,bhkd->bhqk', q, k, precision=P) * scale
    p = jax.nn.softmax(s, axis=-1)
    o = jnp.einsum('bhqk,bhkd->bhqd', p, v, precision=P)
    o = o.transpose(0, 2, 1, 3).reshape(-1, T, D)
    out = jnp.einsum('btd,ed->bte', o, wout_n, precision=P)
    return out.reshape(*batch, T, D).astype(x.dtype)


if __name__ == "__main__":
    key = jax.random.PRNGKey(0)

    # --- small case: single tile, D < 128 (layout smoke test) ---
    B, T, D, H = 2, 8, 32, 4
    k1, k2, k3, key = jax.random.split(key, 4)
    x = jax.random.normal(k1, (B, T, D), dtype=jnp.float32)
    # MPLinearChunk(in_dim, in_dim, 3, normal_init=True): weight (3*D, D)
    wqkv = jax.random.normal(k2, (3 * D, D), dtype=jnp.float32)
    # MPLinear(in_dim, in_dim): weight (D, D)
    wout = jax.random.normal(k3, (D, D), dtype=jnp.float32)

    out = jax.block_until_ready(attention_forward(x, wqkv, wout, H))
    ref = attention_reference(x, wqkv, wout, H)
    assert out.shape == x.shape
    err = float(jnp.max(jnp.abs(out - ref)))
    # Tolerance covers MXU f32 pass differences vs. the HIGHEST-precision ref.
    assert jnp.allclose(out, ref, atol=5e-3, rtol=5e-3), (
        f"small case mismatch, max abs err = {err}")

    # --- larger ragged case: exercises the kv pre-pass, multi-tile flash path
    #     (online-softmax carry across kv tiles) and padded-key masking ---
    B2, T2, D2, H2 = 1, 700, 128, 4
    k4, k5, k6, key = jax.random.split(key, 4)
    x2 = jax.random.normal(k4, (B2, T2, D2), dtype=jnp.float32)
    wqkv2 = jax.random.normal(k5, (3 * D2, D2), dtype=jnp.float32)
    wout2 = jax.random.normal(k6, (D2, D2), dtype=jnp.float32)

    out2 = jax.block_until_ready(attention_forward(x2, wqkv2, wout2, H2))
    ref2 = attention_reference(x2, wqkv2, wout2, H2)
    assert out2.shape == x2.shape
    err2 = float(jnp.max(jnp.abs(out2 - ref2)))
    assert jnp.allclose(out2, ref2, atol=5e-3, rtol=5e-3), (
        f"large case mismatch, max abs err = {err2}")

    print("KERNEL_OK")
</pallas_src>

<mosaic_0001>
module attributes {stable_mosaic.version = 11 : i64} {
  func.func @kv_project_kernel(%arg0: i32, %arg1: i32, %arg2: memref<1x8x32xf32, #tpu.memory_space<vmem>>, %arg3: memref<32x64xf32, #tpu.memory_space<vmem>>, %arg4: memref<1x4x8x8xf32, #tpu.memory_space<vmem>>, %arg5: memref<1x4x8x8xf32, #tpu.memory_space<vmem>>) attributes {dimension_semantics = [#tpu.dimension_semantics<parallel>, #tpu.dimension_semantics<parallel>], iteration_bounds = array<i64: 2, 1>, scalar_prefetch = 0 : i64, scratch_operands = 0 : i64, tpu.core_type = #tpu.core_type<tc>, window_params = [{transform_indices = @transform_0, window_bounds = array<i64: 1, 8, 32>}, {pipeline_mode = #tpu.pipeline_mode<synchronous>, transform_indices = @transform_1, window_bounds = array<i64: 32, 64>}, {transform_indices = @transform_2, window_bounds = array<i64: 1, 4, 8, 8>}, {transform_indices = @transform_3, window_bounds = array<i64: 1, 4, 8, 8>}]} {
    %c0 = arith.constant 0 : index
    %c0_0 = arith.constant 0 : index
    %c0_1 = arith.constant 0 : index
    %0 = vector.load %arg2[%c0, %c0_0, %c0_1] : memref<1x8x32xf32, #tpu.memory_space<vmem>>, vector<1x8x32xf32>
    %1 = vector.shape_cast %0 : vector<1x8x32xf32> to vector<8x32xf32>
    %c0_2 = arith.constant 0 : index
    %c0_3 = arith.constant 0 : index
    %2 = vector.load %arg3[%c0_2, %c0_3] : memref<32x64xf32, #tpu.memory_space<vmem>>, vector<32x64xf32>
    %cst = arith.constant dense<0.000000e+00> : vector<8x64xf32>
    %3 = tpu.matmul %1, %2, %cst {dimension_numbers = #tpu.dot_dimension_numbers<[1], [0], [0], [1], [0, 0, 1, 1], [], []>} : vector<8x32xf32>, vector<32x64xf32>, vector<8x64xf32> -> vector<8x64xf32>
    %4 = vector.extract_strided_slice %3 {offsets = [0, 0], sizes = [8, 8], strides = [1, 1]} : vector<8x64xf32> to vector<8x8xf32>
    %5 = vector.extract_strided_slice %3 {offsets = [0, 8], sizes = [8, 8], strides = [1, 1]} : vector<8x64xf32> to vector<8x8xf32>
    %6 = vector.extract_strided_slice %3 {offsets = [0, 16], sizes = [8, 8], strides = [1, 1]} : vector<8x64xf32> to vector<8x8xf32>
    %7 = vector.extract_strided_slice %3 {offsets = [0, 24], sizes = [8, 8], strides = [1, 1]} : vector<8x64xf32> to vector<8x8xf32>
    %8 = vector.shape_cast %4 : vector<8x8xf32> to vector<1x8x8xf32>
    %9 = vector.shape_cast %5 : vector<8x8xf32> to vector<1x8x8xf32>
    %10 = vector.shape_cast %6 : vector<8x8xf32> to vector<1x8x8xf32>
    %11 = vector.shape_cast %7 : vector<8x8xf32> to vector<1x8x8xf32>
    %12 = tpu.concatenate %8, %9, %10, %11 in 0 : vector<1x8x8xf32>, vector<1x8x8xf32>, vector<1x8x8xf32>, vector<1x8x8xf32> -> vector<4x8x8xf32>
    %13 = vector.extract_strided_slice %3 {offsets = [0, 32], sizes = [8, 8], strides = [1, 1]} : vector<8x64xf32> to vector<8x8xf32>
    %14 = vector.extract_strided_slice %3 {offsets = [0, 40], sizes = [8, 8], strides = [1, 1]} : vector<8x64xf32> to vector<8x8xf32>
    %15 = vector.extract_strided_slice %3 {offsets = [0, 48], sizes = [8, 8], strides = [1, 1]} : vector<8x64xf32> to vector<8x8xf32>
    %16 = vector.extract_strided_slice %3 {offsets = [0, 56], sizes = [8, 8], strides = [1, 1]} : vector<8x64xf32> to vector<8x8xf32>
    %17 = vector.shape_cast %13 : vector<8x8xf32> to vector<1x8x8xf32>
    %18 = vector.shape_cast %14 : vector<8x8xf32> to vector<1x8x8xf32>
    %19 = vector.shape_cast %15 : vector<8x8xf32> to vector<1x8x8xf32>
    %20 = vector.shape_cast %16 : vector<8x8xf32> to vector<1x8x8xf32>
    %21 = tpu.concatenate %17, %18, %19, %20 in 0 : vector<1x8x8xf32>, vector<1x8x8xf32>, vector<1x8x8xf32>, vector<1x8x8xf32> -> vector<4x8x8xf32>
    %22 = arith.mulf %12, %12 : vector<4x8x8xf32>
    %cst_4 = arith.constant dense<0.000000e+00> : vector<4x8xf32>
    %23 = vector.multi_reduction <add>, %22, %cst_4 [2] : vector<4x8x8xf32> to vector<4x8xf32>
    %24 = vector.shape_cast %23 : vector<4x8xf32> to vector<4x8x1xf32>
    %25 = math.sqrt %24 : vector<4x8x1xf32>
    %cst_5 = arith.constant 0.353553385 : f32
    %26 = vector.broadcast %cst_5 : f32 to vector<4x8x1xf32>
    %27 = arith.mulf %25, %26 : vector<4x8x1xf32>
    %cst_6 = arith.constant 9.99999974E-5 : f32
    %28 = vector.broadcast %cst_6 : f32 to vector<4x8x1xf32>
    %29 = arith.addf %28, %27 : vector<4x8x1xf32>
    %30 = vector.broadcast %29 : vector<4x8x1xf32> to vector<4x8x8xf32>
    %31 = arith.divf %12, %30 : vector<4x8x8xf32>
    %c0_7 = arith.constant 0 : index
    %c0_8 = arith.constant 0 : index
    %c0_9 = arith.constant 0 : index
    %c0_10 = arith.constant 0 : index
    %32 = vector.load %arg4[%c0_7, %c0_8, %c0_9, %c0_10] : memref<1x4x8x8xf32, #tpu.memory_space<vmem>>, vector<1x4x8x8xf32>
    %33 = vector.shape_cast %32 : vector<1x4x8x8xf32> to vector<4x8x8xf32>
    %34 = vector.shape_cast %31 : vector<4x8x8xf32> to vector<1x4x8x8xf32>
    tpu.vector_store %arg4[%c0_7, %c0_8, %c0_9, %c0_10], %34 {strides = array<i32>} : memref<1x4x8x8xf32, #tpu.memory_space<vmem>>, vector<1x4x8x8xf32>,
    %c0_11 = arith.constant 0 : index
    %c0_12 = arith.constant 0 : index
    %c0_13 = arith.constant 0 : index
    %c0_14 = arith.constant 0 : index
    %35 = vector.load %arg5[%c0_11, %c0_12, %c0_13, %c0_14] : memref<1x4x8x8xf32, #tpu.memory_space<vmem>>, vector<1x4x8x8xf32>
    %36 = vector.shape_cast %35 : vector<1x4x8x8xf32> to vector<4x8x8xf32>
    %37 = vector.shape_cast %21 : vector<4x8x8xf32> to vector<1x4x8x8xf32>
    tpu.vector_store %arg5[%c0_11, %c0_12, %c0_13, %c0_14], %37 {strides = array<i32>} : memref<1x4x8x8xf32, #tpu.memory_space<vmem>>, vector<1x4x8x8xf32>,
    return
  }
  func.func @transform_0(%arg0: i32, %arg1: i32) -> (i32, i32, i32) {
    %c0_i32 = arith.constant 0 : i32
    %c0_i32_0 = arith.constant 0 : i32
    return %arg0, %arg1, %c0_i32 : i32, i32, i32
  }
  func.func @transform_1(%arg0: i32, %arg1: i32) -> (i32, i32) {
    %c0_i32 = arith.constant 0 : i32
    %c0_i32_0 = arith.constant 0 : i32
    %c0_i32_1 = arith.constant 0 : i32
    return %c0_i32, %c0_i32_0 : i32, i32
  }
  func.func @transform_2(%arg0: i32, %arg1: i32) -> (i32, i32, i32, i32) {
    %c0_i32 = arith.constant 0 : i32
    %c0_i32_0 = arith.constant 0 : i32
    %c0_i32_1 = arith.constant 0 : i32
    return %arg0, %c0_i32, %arg1, %c0_i32_0 : i32, i32, i32, i32
  }
  func.func @transform_3(%arg0: i32, %arg1: i32) -> (i32, i32, i32, i32) {
    %c0_i32 = arith.constant 0 : i32
    %c0_i32_0 = arith.constant 0 : i32
    %c0_i32_1 = arith.constant 0 : i32
    return %arg0, %c0_i32, %arg1, %c0_i32_0 : i32, i32, i32, i32
  }
}

module attributes {stable_mosaic.version = 11 : i64} {
  func.func @kv_project_kernel(%arg0: i32, %arg1: i32, %arg2: memref<1x8x32xf32, #tpu.memory_space<vmem>>, %arg3: memref<32x64xf32, #tpu.memory_space<vmem>>, %arg4: memref<1x4x8x8xf32, #tpu.memory_space<vmem>>, %arg5: memref<1x4x8x8xf32, #tpu.memory_space<vmem>>) attributes {dimension_semantics = [#tpu.dimension_semantics<parallel>, #tpu.dimension_semantics<parallel>], iteration_bounds = array<i64: 2, 1>, scalar_prefetch = 0 : i64, scratch_operands = 0 : i64, tpu.core_type = #tpu.core_type<tc>, window_params = [{transform_indices = @transform_0, window_bounds = array<i64: 1, 8, 32>}, {pipeline_mode = #tpu.pipeline_mode<synchronous>, transform_indices = @transform_1, window_bounds = array<i64: 32, 64>}, {transform_indices = @transform_2, window_bounds = array<i64: 1, 4, 8, 8>}, {transform_indices = @transform_3, window_bounds = array<i64: 1, 4, 8, 8>}]} {
    %c0 = arith.constant 0 : index
    %c0_0 = arith.constant 0 : index
    %c0_1 = arith.constant 0 : index
    %0 = vector.load %arg2[%c0, %c0_0, %c0_1] : memref<1x8x32xf32, #tpu.memory_space<vmem>>, vector<1x8x32xf32>
    %1 = vector.shape_cast %0 : vector<1x8x32xf32> to vector<8x32xf32>
    %c0_2 = arith.constant 0 : index
    %c0_3 = arith.constant 0 : index
    %2 = vector.load %arg3[%c0_2, %c0_3] : memref<32x64xf32, #tpu.memory_space<vmem>>, vector<32x64xf32>
    %cst = arith.constant dense<0.000000e+00> : vector<8x64xf32>
    %3 = tpu.matmul %1, %2, %cst {dimension_numbers = #tpu.dot_dimension_numbers<[1], [0], [0], [1], [0, 0, 1, 1], [], []>} : vector<8x32xf32>, vector<32x64xf32>, vector<8x64xf32> -> vector<8x64xf32>
    %4 = vector.extract_strided_slice %3 {offsets = [0, 0], sizes = [8, 8], strides = [1, 1]} : vector<8x64xf32> to vector<8x8xf32>
    %5 = vector.extract_strided_slice %3 {offsets = [0, 8], sizes = [8, 8], strides = [1, 1]} : vector<8x64xf32> to vector<8x8xf32>
    %6 = vector.extract_strided_slice %3 {offsets = [0, 16], sizes = [8, 8], strides = [1, 1]} : vector<8x64xf32> to vector<8x8xf32>
    %7 = vector.extract_strided_slice %3 {offsets = [0, 24], sizes = [8, 8], strides = [1, 1]} : vector<8x64xf32> to vector<8x8xf32>
    %8 = vector.shape_cast %4 : vector<8x8xf32> to vector<1x8x8xf32>
    %9 = vector.shape_cast %5 : vector<8x8xf32> to vector<1x8x8xf32>
    %10 = vector.shape_cast %6 : vector<8x8xf32> to vector<1x8x8xf32>
    %11 = vector.shape_cast %7 : vector<8x8xf32> to vector<1x8x8xf32>
    %12 = tpu.concatenate %8, %9, %10, %11 in 0 : vector<1x8x8xf32>, vector<1x8x8xf32>, vector<1x8x8xf32>, vector<1x8x8xf32> -> vector<4x8x8xf32>
    %13 = vector.extract_strided_slice %3 {offsets = [0, 32], sizes = [8, 8], strides = [1, 1]} : vector<8x64xf32> to vector<8x8xf32>
    %14 = vector.extract_strided_slice %3 {offsets = [0, 40], sizes = [8, 8], strides = [1, 1]} : vector<8x64xf32> to vector<8x8xf32>
    %15 = vector.extract_strided_slice %3 {offsets = [0, 48], sizes = [8, 8], strides = [1, 1]} : vector<8x64xf32> to vector<8x8xf32>
    %16 = vector.extract_strided_slice %3 {offsets = [0, 56], sizes = [8, 8], strides = [1, 1]} : vector<8x64xf32> to vector<8x8xf32>
    %17 = vector.shape_cast %13 : vector<8x8xf32> to vector<1x8x8xf32>
    %18 = vector.shape_cast %14 : vector<8x8xf32> to vector<1x8x8xf32>
    %19 = vector.shape_cast %15 : vector<8x8xf32> to vector<1x8x8xf32>
    %20 = vector.shape_cast %16 : vector<8x8xf32> to vector<1x8x8xf32>
    %21 = tpu.concatenate %17, %18, %19, %20 in 0 : vector<1x8x8xf32>, vector<1x8x8xf32>, vector<1x8x8xf32>, vector<1x8x8xf32> -> vector<4x8x8xf32>
    %22 = arith.mulf %12, %12 : vector<4x8x8xf32>
    %cst_4 = arith.constant dense<0.000000e+00> : vector<4x8xf32>
    %23 = vector.multi_reduction <add>, %22, %cst_4 [2] : vector<4x8x8xf32> to vector<4x8xf32>
    %24 = vector.shape_cast %23 : vector<4x8xf32> to vector<4x8x1xf32>
    %25 = math.sqrt %24 : vector<4x8x1xf32>
    %cst_5 = arith.constant 0.353553385 : f32
    %26 = vector.broadcast %cst_5 : f32 to vector<4x8x1xf32>
    %27 = arith.mulf %25, %26 : vector<4x8x1xf32>
    %cst_6 = arith.constant 9.99999974E-5 : f32
    %28 = vector.broadcast %cst_6 : f32 to vector<4x8x1xf32>
    %29 = arith.addf %28, %27 : vector<4x8x1xf32>
    %30 = vector.broadcast %29 : vector<4x8x1xf32> to vector<4x8x8xf32>
    %31 = arith.divf %12, %30 : vector<4x8x8xf32>
    %c0_7 = arith.constant 0 : index
    %c0_8 = arith.constant 0 : index
    %c0_9 = arith.constant 0 : index
    %c0_10 = arith.constant 0 : index
    %32 = vector.load %arg4[%c0_7, %c0_8, %c0_9, %c0_10] : memref<1x4x8x8xf32, #tpu.memory_space<vmem>>, vector<1x4x8x8xf32>
    %33 = vector.shape_cast %32 : vector<1x4x8x8xf32> to vector<4x8x8xf32>
    %34 = vector.shape_cast %31 : vector<4x8x8xf32> to vector<1x4x8x8xf32>
    tpu.vector_store %arg4[%c0_7, %c0_8, %c0_9, %c0_10], %34 {strides = array<i32>} : memref<1x4x8x8xf32, #tpu.memory_space<vmem>>, vector<1x4x8x8xf32>,
    %c0_11 = arith.constant 0 : index
    %c0_12 = arith.constant 0 : index
    %c0_13 = arith.constant 0 : index
    %c0_14 = arith.constant 0 : index
    %35 = vector.load %arg5[%c0_11, %c0_12, %c0_13, %c0_14] : memref<1x4x8x8xf32, #tpu.memory_space<vmem>>, vector<1x4x8x8xf32>
    %36 = vector.shape_cast %35 : vector<1x4x8x8xf32> to vector<4x8x8xf32>
    %37 = vector.shape_cast %21 : vector<4x8x8xf32> to vector<1x4x8x8xf32>
    tpu.vector_store %arg5[%c0_11, %c0_12, %c0_13, %c0_14], %37 {strides = array<i32>} : memref<1x4x8x8xf32, #tpu.memory_space<vmem>>, vector<1x4x8x8xf32>,
    return
  }
  func.func @transform_0(%arg0: i32, %arg1: i32) -> (i32, i32, i32) {
    %c0_i32 = arith.constant 0 : i32
    %c0_i32_0 = arith.constant 0 : i32
    return %arg0, %arg1, %c0_i32 : i32, i32, i32
  }
  func.func @transform_1(%arg0: i32, %arg1: i32) -> (i32, i32) {
    %c0_i32 = arith.constant 0 : i32
    %c0_i32_0 = arith.constant 0 : i32
    %c0_i32_1 = arith.constant 0 : i32
    return %c0_i32, %c0_i32_0 : i32, i32
  }
  func.func @transform_2(%arg0: i32, %arg1: i32) -> (i32, i32, i32, i32) {
    %c0_i32 = arith.constant 0 : i32
    %c0_i32_0 = arith.constant 0 : i32
    %c0_i32_1 = arith.constant 0 : i32
    return %arg0, %c0_i32, %arg1, %c0_i32_0 : i32, i32, i32, i32
  }
  func.func @transform_3(%arg0: i32, %arg1: i32) -> (i32, i32, i32, i32) {
    %c0_i32 = arith.constant 0 : i32
    %c0_i32_0 = arith.constant 0 : i32
    %c0_i32_1 = arith.constant 0 : i32
    return %arg0, %c0_i32, %arg1, %c0_i32_0 : i32, i32, i32, i32
  }
}

</mosaic_0001>

<bundles_post_ra>
// kernel: tpu_custom_call.1
= control target key start
LH: loop header
LB: loop body
LE: loop exit
PB: predicated region body
PF: predicated region fallthrough
CT: control target
= control target key end

     0   :  { %9 = vsyncpa [#allocation3], 0  ;;  %s1178_s0 = inlined_call_operand.hbm [shape: f32[2,8,32], index: 0, kind: input, shape index: {}]   ;;  %s1179_s1 = inlined_call_operand.hbm [shape: f32[32,64], index: 1, kind: input, shape index: {}]   ;;  %s1180_s2 = inlined_call_operand.hbm [shape: f32[2,4,8,8], index: 2, kind: output, shape index: {0}]   ;;  %s1181_s3 = inlined_call_operand.hbm [shape: f32[2,4,8,8], index: 3, kind: output, shape index: {1}]  }
   0x1   :  { %11 = vsyncpa [#allocation3 + $0x1], 0 }
   0x2   :  { %12 = vsyncpa [#allocation6], 0 }
   0x3   :  { %13 = vsyncpa [#allocation4], 0 }
   0x4   :  { %15 = vsyncpa [#allocation4 + $0x1], 0 }
   0x5   :  { %16 = vsyncpa [#allocation9], 0 }
   0x6   :  { %18 = vsyncpa [#allocation9 + $0x1], 0  ;;  %s913_s12 = smov 0   ;;  %s915_s13 = smov 0  }
   0x7   :  { %s917_s14 = smov 0   ;;  %s919_s15 = smov 0  }
   0x8   :  { %s921_s16 = smov 0   ;;  %s923_s17 = smov 0  }
   0x9 LB: > { %s566_s18 = sadd.s32 4294967295, %s877_s17   ;;  %s567_s19 = sadd.s32 4294967294, %s877_s17   ;;  %s877_s17 = sphi %s923_s17, %s24_s17   ;;  %s873_s16 = sphi %s921_s16, %s1199_s16   ;;  %s869_s15 = sphi %s919_s15, %s1198_s15   ;;  %s865_s14 = sphi %s917_s14, %s1197_s14   ;;  %s861_s13 = sphi %s915_s13, %s1196_s13   ;;  %s857_s12 = sphi %s913_s12, %s1195_s12  }
   0xa   : > { %p58_p0 = scmp.ne.s32.totalorder %s861_s13, %s857_s12  ;;  %p947_p1 = scmp.eq.s32.totalorder %s566_s18, 0 }
   0xb   : > { %p951_p2 = scmp.eq.s32.totalorder %s566_s18, 1  ;;  %p111_p3 = scmp.eq.s32.totalorder %s567_s19, 1 }
   0xc   : > { %p957_p4 = por %p947_p1, %p58_p0  ;;  %p568_p5 = scmp.ge.s32.totalorder %s877_s17, 1 }
   0xd   : > { %p962_p6 = por %p111_p3, %p58_p0  ;;  %p146_p7 = scmp.lt.s32.totalorder %s877_s17, 3 }
   0xe   : > { %s1185_s22 = scalar_select %p957_p4, 1, 0 }
   0xf   : > { %s1186_s23 = scalar_select %p962_p6, 1, 0 }
  0x10   : > { %p967_p8 = pnand %p568_p5, %p146_p7  ;;  %s879_s25 = smov [#allocation5]  }
  0x11   : > { %s158_s26 = sshll.u32 %s879_s25, 4  ;;  %s36_s28 = sadd.s32 1, %s873_s16  ;;  %s159_s26 = int_to_ptr.vmem [resolvable:$true] %s158_s26 }
  0x12   : > { %p615_p9 = pneg %p967_p8  ;;  %s720_s29 = scalar_lea.vmem %s159_s26, 512 }
  0x13   : > { %p721_p13 = scmp.ne.s32.totalorder %s159_s26, %s720_s29  ;;  %p728_p5 = scmp.lt.s32.totalorder %s159_s26, %s159_s26 }
  0x14   : > { %p976_p11 = pnand %p615_p9, %p947_p1  ;;  %p729_p7 = scmp.lt.s32.totalorder %s720_s29, %s720_s29 }
  0x16   : > { %p711_p12 = pneg %p976_p11  ;;  %p730_p6 = por %p729_p7, %p728_p5 }
  0x18   : > { %p723_p0 = pnand %p721_p13, %p711_p12 }
  0x1a   : > { %p724_p3 = pneg %p723_p0 }
  0x1c   : > { %p731_p4 = pnand %p730_p6, %p724_p3 }
  0x1e   : > { %734 = shalt.err (!%p731_p4)
}
  0x1f   : > { %s880_s30 = smov 128   ;;  %s881_s4 = smov 8  }
  0x20   : > { %618 = dma.hbm_to_vmem [thread:$0]  (!%p976_p11), %s1179_s1, 512, %s159_s26, [#allocation6], %s880_s30, %s880_s30, %s881_s4  }
  0x21   : > { %p38_p6 = scmp.ge.s32.totalorder %s36_s28, 2  ;;  %s45_s7 = sadd.s32 1, %s865_s14 }
  0x22   : > { %p52_p4 = scmp.ne.s32.totalorder %s865_s14, %s861_s13  ;;  %p53_p9 = scmp.eq.s32.totalorder %s877_s17, 0 }
  0x23   : > { %s1201_s28 = smov (%p38_p6, %s36_s28), 0  ;;  %p631_p0 = scmp.lt.s32.totalorder %s877_s17, 2 }
  0x24   : > { %p994_p12 = por %p53_p9, %p52_p4  ;;  %p1000_p13 = por %p951_p2, %p52_p4 }
  0x25   : > { %s40_s10 = ssub.s32 %s873_s16, %s1201_s28  ;;  %s172_s11 = sand.u32 1, %s865_s14  }
  0x26   : > { %p43_p11 = scmp.eq.s32.totalorder %s40_s10, 0  ;;  %s571_s18 = sshll.u32 %s172_s11, 3 }
  0x27   : > { %s572_s25 = sshll.u32 %s873_s16, 7  ;;  %s176_s30 = scalar_lea.vmem [#allocation2], %s571_s18 }
  0x28   : > { %s1009_s19 = scalar_select %p43_p11, %s865_s14, %s45_s7  }
  0x29   : > { %s182_s29 = scalar_lea.hbm %s1178_s0, %s572_s25  ;;  %s184_s4 = sshll.u32 %s176_s30, 4  ;;  %s185_s4 = int_to_ptr.vmem [resolvable:$true] %s184_s4 }
  0x2a   : > { %p1017_p2 = pnand %p631_p0, %p994_p12  ;;  %s173_s5 = scalar_lea.sflag [#allocation3], %s172_s11 }
  0x2b   : > { %s748_s6 = scalar_lea.vmem %s185_s4, 128  ;;  %s882_s7 = smov [#allocation2]  }
  0x2c   : > { %p737_p3 = pneg %p1017_p2  ;;  %p749_p5 = scmp.ne.s32.totalorder %s185_s4, %s748_s6 }
  0x2d   : > { %s753_s10 = sshll.u32 %s882_s7, 4  ;;  %s754_s10 = int_to_ptr.vmem [resolvable:$false] %s753_s10 }
  0x2e   : > { %p751_p7 = pnand %p749_p5, %p737_p3  ;;  %s755_s25 = scalar_lea.vmem %s754_s10, 256 }
  0x2f   : > { %p756_p4 = scmp.lt.s32.totalorder %s185_s4, %s754_s10  ;;  %p757_p9 = scmp.lt.s32.totalorder %s755_s25, %s748_s6 }
  0x30   : > { %p752_p6 = pneg %p751_p7 }
  0x31   : > { %p758_p11 = por %p757_p9, %p756_p4 }
  0x33   : > { %p759_p10 = pnand %p758_p11, %p752_p6 }
  0x35   : > { %762 = shalt.err (!%p759_p10)
}
  0x36   : > { %622 = dma.hbm_to_vmem [thread:$0]  (!%p1017_p2), %s182_s29, 128, %s185_s4, %s173_s5  }
  0x37   : > { %193 = sbr.rel (%p967_p8) target bundleno = 585 (0x249), region = 28  ;;  %s1028_s8 = sand.u32 (!%p967_p8), 1, %s861_s13  }
  0x38   : > { %s574_s11 = sshll.u32 (!%p967_p8), %s1028_s8, 3  ;;  %s196_s18 = scalar_lea.sflag (!%p967_p8), [#allocation3], %s1028_s8 }
  0x39   : > { %s199_s26 = scalar_lea.vmem (!%p967_p8), [#allocation2], %s574_s11  ;;  %p1192_p12 = scmp.ne.s32.totalorder (!%p967_p8), %s1185_s22, 0 }
  0x3c   : > { %840 = dma.done.wait (%p1192_p12), %s196_s18, 128  }
  0x3d   : > { %842 = vsyncadd (%p1192_p12), %s196_s18, 4294967168 }
  0x3e   : > { %844 = dma.done.wait (%p947_p1), [#allocation6], 512  }
  0x3f   : > { %846 = vsyncadd (%p947_p1), [#allocation6], 4294966784  ;;  %v883_v0 = vmov 0.0   ;;  %vm884_vm0 = vmmov 0   ;;  %v235_v1 = vld [vmem:[#allocation5 + $0x18] sm:$0xff]  ;;  %v234_v2 = vld [vmem:[#allocation5 + $0x10] sm:$0xff] }
  0x40   : > { %594 = vmatprep.subr.mxu0 %v883_v0  ;;  %602 = vmatprep.mubr.msk.f32.mxu0 %vm884_vm0, %v883_v0  ;;  %v233_v3 = vld [vmem:[#allocation5 + $0x8] sm:$0xff]  ;;  %v232_v4 = vld [vmem:[#allocation5] sm:$0xff]  ;;  %v231_v5 = vld [vmem:[%s199_s26] sm:$0xff]  ;;  %vm236_vm1 = vcmask 261120   ;;  %s885_s20 = smov 104   ;;  %s886_s22 = smov 120  }
  0x41   : > { %595 = vmatpush3.msra.mxu0 %v235_v1  ;;  %s887_s24 = smov 112   ;;  %vm324_vm2 = vcmask 64512   ;;  %s888_s27 = smov 96  }
  0x42   : > { %596 = vmatprep.subr.mxu0 %v883_v0  ;;  %s576_s29 = sshll.u32 %s1028_s8, 5  ;;  %s587_s5 = sshll.u32 %s869_s15, 9 }
  0x43   : > { %597 = vmatpush3.msra.mxu0 %v234_v2  ;;  %s1060_s30 = scalar_lea.vmem [#allocation7], %s576_s29  ;;  %s230_s4 = scalar_lea.vmem [#allocation8], %s576_s29 }
  0x44   : > { %598 = vmatprep.subr.mxu0 %v883_v0  ;;  %s438_s21 = sshll.u32 %s230_s4, 4  ;;  %s1078_s10 = scalar_lea.hbm %s1181_s3, %s587_s5  ;;  %s1069_s21 = int_to_ptr.vmem [resolvable:$true] %s438_s21 }
  0x45   : > { %599 = vmatpush3.msra.mxu0 %v233_v3  ;;  %s407_s25 = scalar_lea.sflag [#allocation9], %s1028_s8  ;;  %s763_s11 = scalar_lea.vmem %s1069_s21, 512 }
  0x46   : > { %600 = vmatprep.subr.mxu0 %v883_v0  ;;  %p764_p1 = scmp.ne.s32.totalorder %s1069_s21, %s763_s11  ;;  %s889_s18 = smov [#allocation8]  }
  0x47   : > { %601 = vmatpush3.msra.mxu0 %v232_v4  ;;  %s767_s26 = sshll.u32 %s889_s18, 4  ;;  %s768_s26 = int_to_ptr.vmem [resolvable:$false] %s767_s26 }
  0x48   : > { %603 = vmatmul.mubr.msk.f32.vlgmr.msra.gmra.mxu0 %vm236_vm1, %v231_v5  ;;  %p765_p8 = pnand %p764_p1, %p1000_p13  ;;  %p770_p0 = scmp.lt.s32.totalorder %s1069_s21, %s768_s26 }
  0x4a   : > { %p766_p10 = pneg %p765_p8 }
 0x108   : > { %v306_v6 = vpop.f32.mrf.mxu0 }
 0x109   : > { %317 = vrot.lane.b32.xlu1 %v306_v6, %s885_s20  ;;  %311 = vrot.lane.b32.xlu0 %v306_v6, %s886_s22  ;;  %v320_v8 = vmul.f32 %v306_v6, %v306_v6  ;;  %s769_s20 = scalar_lea.vmem %s768_s26, 1024 }
 0x10a   : > { %v604_v7 = vpop.f32.mrf.mxu0  ;;  %p771_p2 = scmp.lt.s32.totalorder %s769_s20, %s763_s11 }
 0x10b   : > { %v325_v9 = vsel %vm324_vm2, %v320_v8, 0.0 }
 0x10c   : > { %p772_p3 = por %p771_p2, %p770_p0 }
 0x10d   : > { %314 = vrot.lane.b32.xlu0 %v306_v6, %s887_s24 }
 0x10e   : > { %p773_p5 = pnand %p772_p3, %p766_p10 }
 0x12d   : > { %326 = vadd.xlane.f32.xlu1 %v325_v9 }
 0x17b   : > { %v1041_v10 = vpop.permute.xlu1 %317  ;;  %v1043_v11 = vpop.permute.xlu0 %311 }
 0x17c   : > { %v321_v12 = vmul.f32 %v1043_v11, %v1043_v11  ;;  %v323_v13 = vmul.f32 %v1041_v10, %v1041_v10 }
 0x17e   : > { %v328_v14 = vsel %vm324_vm2, %v321_v12, 0.0  ;;  %v334_v15 = vsel %vm324_vm2, %v323_v13, 0.0 }
 0x17f   : > { %329 = vadd.xlane.f32.xlu0 %v328_v14  ;;  %v1051_v16 = vpop.permute.xlu0 %314  ;;  %335 = vadd.xlane.f32.xlu1 %v334_v15 }
 0x180   : > { %v322_v17 = vmul.f32 %v1051_v16, %v1051_v16 }
 0x182   : > { %v331_v18 = vsel %vm324_vm2, %v322_v17, 0.0 }
 0x183   : > { %332 = vadd.xlane.f32.xlu0 %v331_v18 }
 0x190   : > { %387 = vrot.lane.b32.xlu1 %v1043_v11, %s888_s27 }
 0x194   : > { %389 = vrot.lane.b32.xlu1 %v1051_v16, %s888_s27 }
 0x199   : > { %385 = vrot.lane.b32.xlu0 %v306_v6, %s888_s27 }
 0x19d   : > { %391 = vrot.lane.b32.xlu0 %v1041_v10, %s888_s27 }
 0x1b6   : > { %v327_v19 = vpop.xlane.xlu1 %326 }
 0x1b7   : > { %693 = vrsqrt.f32 %v327_v19  ;;  %vm339_vm3 = vcmp.eq.f32.partialorder %v327_v19, inf  ;;  %v342_v22 = vand.u32 2147483648, %v327_v19  ;;  %vm341_vm4 = vcmp.eq.f32.partialorder %v327_v19, 0.0 }
 0x1c4   : > { %v694_v20 = vpop.eup %693 }
 0x1c5   : > { %v338_v21 = vmul.f32 %v694_v20, %v327_v19 }
 0x1c7   : > { %v340_v23 = vsel %vm339_vm3, %v327_v19, %v338_v21 }
 0x1c8   : > { %v343_v24 = vsel %vm341_vm4, %v342_v22, %v340_v23 }
 0x1c9   : > { %v365_v25 = vmul.f32 0.35355338, %v343_v24 }
 0x1cb   : > { %v369_v26 = vadd.f32 0.0001, %v365_v25 }
 0x1cd   : > { %695 = vrcp.f32 %v369_v26 }
 0x1da   : > { %v696_v27 = vpop.eup %695 }
 0x1db   : > { %v374_v28 = vmul.f32 %v696_v27, %v306_v6 }
 0x1dd   : > { %381 = vst.msk [vmem:[%s1060_s30] sm:$0xff] %vm324_vm2, %v374_v28 }
 0x208   : > { %v330_v29 = vpop.xlane.xlu0 %329  ;;  %v336_v30 = vpop.xlane.xlu1 %335 }
 0x209   : > { %697 = vrsqrt.f32 %v330_v29 }
 0x20a   : > { %699 = vrsqrt.f32 %v336_v30 }
 0x20c   : > { %v1064_v31 = vpop.xlane.xlu0 %332  ;;  %v388_v32 = vpop.permute.xlu1 %387 }
 0x20d   : > { %701 = vrsqrt.f32 %v1064_v31  ;;  %398 = vst.msk [vmem:[%s230_s4 + $0x8] sm:$0xff] %vm324_vm2, %v388_v32 }
 0x210   : > { %v386_v33 = vpop.permute.xlu0 %385  ;;  %v390_v34 = vpop.permute.xlu1 %389 }
 0x211   : > { %397 = vst.msk [vmem:[%s230_s4] sm:$0xff] %vm324_vm2, %v386_v33  ;;  %399 = vst.msk [vmem:[%s230_s4 + $0x10] sm:$0xff] %vm324_vm2, %v390_v34 }
 0x214   : > { %v392_v35 = vpop.permute.xlu0 %391 }
 0x215   : > { %400 = vst.msk [vmem:[%s230_s4 + $0x18] sm:$0xff] %vm324_vm2, %v392_v35 }
 0x216   : > { %v698_v36 = vpop.eup %697 }
 0x217   : > { %776 = shalt.err (!%p773_p5)
}
 0x218   : > { %s777_s22 = scalar_lea.hbm %s1078_s10, 512  ;;  %s781_s29 = scalar_lea.hbm %s1181_s3, 1024 }
 0x219   : > { %p778_p7 = scmp.ne.s32.totalorder %s1078_s10, %s777_s22  ;;  %p782_p9 = scmp.lt.s32.totalorder %s1078_s10, %s1181_s3 }
 0x21a   : > { %p783_p11 = scmp.lt.s32.totalorder %s781_s29, %s777_s22 }
 0x21b   : > { %p779_p6 = pnand %p778_p7, %p1000_p13 }
 0x21c   : > { %p784_p12 = por %p783_p11, %p782_p9 }
 0x21d   : > { %p780_p4 = pneg %p779_p6 }
 0x21f   : > { %p785_p1 = pnand %p784_p12, %p780_p4 }
 0x221   : > { %788 = shalt.err (!%p785_p1)
}
 0x222   : > { %s890_s7 = smov 128   ;;  %s891_s11 = smov 8   ;;  %v700_v37 = vpop.eup %699  ;;  %v345_v38 = vmul.f32 %v698_v36, %v330_v29  ;;  %vm346_vm5 = vcmp.eq.f32.partialorder %v330_v29, inf  ;;  %v349_v39 = vand.u32 2147483648, %v330_v29  ;;  %vm348_vm6 = vcmp.eq.f32.partialorder %v330_v29, 0.0 }
 0x223   : > { %612 = dma.vmem_to_hbm [thread:$0]  (%p1000_p13), %s1069_s21, 512, %s1078_s10, %s407_s25, %s890_s7, %s890_s7, %s891_s11   ;;  %v359_v40 = vmul.f32 %v700_v37, %v336_v30  ;;  %vm360_vm7 = vcmp.eq.f32.partialorder %v336_v30, inf  ;;  %v363_v42 = vand.u32 2147483648, %v336_v30  ;;  %v702_v43 = vpop.eup %701  ;;  %vm362_vm8 = vcmp.eq.f32.partialorder %v336_v30, 0.0 }
 0x224   : > { %v347_v41 = vsel %vm346_vm5, %v330_v29, %v345_v38  ;;  %v352_v48 = vmul.f32 %v702_v43, %v1064_v31  ;;  %vm353_vm9 = vcmp.eq.f32.partialorder %v1064_v31, inf  ;;  %v356_v50 = vand.u32 2147483648, %v1064_v31  ;;  %s421_s21 = sshll.u32 %s1060_s30, 4  ;;  %s1127_s18 = scalar_lea.hbm %s1180_s2, %s587_s5  ;;  %s1119_s21 = int_to_ptr.vmem [resolvable:$true] %s421_s21 }
 0x225   : > { %v350_v44 = vsel %vm348_vm6, %v349_v39, %v347_v41  ;;  %v361_v45 = vsel %vm360_vm7, %v336_v30, %v359_v40  ;;  %vm355_vm10 = vcmp.eq.f32.partialorder %v1064_v31, 0.0  ;;  %s402_s26 = scalar_lea.sflag [#allocation4], %s1028_s8  ;;  %s789_s20 = scalar_lea.vmem %s1119_s21, 512 }
 0x226   : > { %v366_v46 = vmul.f32 0.35355338, %v350_v44  ;;  %v364_v47 = vsel %vm362_vm8, %v363_v42, %v361_v45  ;;  %v354_v52 = vsel %vm353_vm9, %v1064_v31, %v352_v48  ;;  %p790_p8 = scmp.ne.s32.totalorder %s1119_s21, %s789_s20  ;;  %s892_s22 = smov [#allocation7]  }
 0x227   : > { %v368_v49 = vmul.f32 0.35355338, %v364_v47  ;;  %v357_v54 = vsel %vm355_vm10, %v356_v50, %v354_v52  ;;  %s793_s24 = sshll.u32 %s892_s22, 4  ;;  %s794_s24 = int_to_ptr.vmem [resolvable:$false] %s793_s24 }
 0x228   : > { %v370_v51 = vadd.f32 0.0001, %v366_v46  ;;  %v367_v55 = vmul.f32 0.35355338, %v357_v54  ;;  %p791_p10 = pnand %p790_p8, %p1000_p13  ;;  %s795_s27 = scalar_lea.vmem %s794_s24, 1024 }
 0x229   : > { %v372_v53 = vadd.f32 0.0001, %v368_v49  ;;  %p796_p2 = scmp.lt.s32.totalorder %s1119_s21, %s794_s24  ;;  %p797_p3 = scmp.lt.s32.totalorder %s795_s27, %s789_s20 }
 0x22a   : > { %703 = vrcp.f32 %v370_v51  ;;  %v371_v56 = vadd.f32 0.0001, %v367_v55  ;;  %p792_p0 = pneg %p791_p10 }
 0x22b   : > { %705 = vrcp.f32 %v372_v53  ;;  %p798_p5 = por %p797_p3, %p796_p2 }
 0x22c   : > { %707 = vrcp.f32 %v371_v56 }
 0x22d   : > { %p799_p7 = pnand %p798_p5, %p792_p0 }
 0x237   : > { %v704_v57 = vpop.eup %703 }
 0x238   : > { %v706_v58 = vpop.eup %705  ;;  %v376_v59 = vmul.f32 %v704_v57, %v1043_v11 }
 0x239   : > { %v380_v60 = vmul.f32 %v706_v58, %v1041_v10  ;;  %v708_v61 = vpop.eup %707 }
 0x23a   : > { %382 = vst.msk [vmem:[%s1060_s30 + $0x8] sm:$0xff] %vm324_vm2, %v376_v59  ;;  %v378_v62 = vmul.f32 %v708_v61, %v1051_v16 }
 0x23b   : > { %384 = vst.msk [vmem:[%s1060_s30 + $0x18] sm:$0xff] %vm324_vm2, %v380_v60 }
 0x23c   : > { %383 = vst.msk [vmem:[%s1060_s30 + $0x10] sm:$0xff] %vm324_vm2, %v378_v62 }
 0x23d   : > { %802 = shalt.err (!%p799_p7)
}
 0x23e   : > { %s803_s15 = scalar_lea.hbm %s1127_s18, 512  ;;  %s807_s5 = scalar_lea.hbm %s1180_s2, 1024 }
 0x23f   : > { %p804_p6 = scmp.ne.s32.totalorder %s1127_s18, %s803_s15  ;;  %p808_p11 = scmp.lt.s32.totalorder %s1127_s18, %s1180_s2 }
 0x240   : > { %p809_p12 = scmp.lt.s32.totalorder %s807_s5, %s803_s15 }
 0x241   : > { %p805_p4 = pnand %p804_p6, %p1000_p13 }
 0x242   : > { %p810_p1 = por %p809_p12, %p808_p11 }
 0x243   : > { %p806_p9 = pneg %p805_p4 }
 0x245   : > { %p811_p8 = pnand %p810_p1, %p806_p9 }
 0x247   : > { %814 = shalt.err (!%p811_p8)
}
 0x248   : > { %611 = dma.vmem_to_hbm [thread:$0]  (%p1000_p13), %s1119_s21, 512, %s1127_s18, %s402_s26, %s890_s7, %s890_s7, %s891_s11  }
 0x249 PF: > { %s453_s6 = sand.u32 1, %s857_s12   ;;  %p1193_p10 = scmp.ne.s32.totalorder %s1186_s23, 0 }
 0x24a   : > { %p1194_p0 = scmp.ge.s32.totalorder %s877_s17, 2  ;;  %s454_s10 = scalar_lea.sflag [#allocation4], %s453_s6 }
 0x24c   : > { %p624_p2 = pnand %p1194_p0, %p1193_p10 }
 0x24e   : > { %p625_p3 = pneg %p624_p2 }
 0x250   : > { %848 = dma.done.wait (%p625_p3), %s454_s10, 512  }
 0x251   : > { %850 = vsyncadd (%p625_p3), %s454_s10, 4294966784  ;;  %s463_s25 = scalar_lea.sflag [#allocation9], %s453_s6 }
 0x252   : > { %852 = dma.done.wait (%p625_p3), %s463_s25, 512  }
 0x253   : > { %854 = vsyncadd (%p625_p3), %s463_s25, 4294966784  ;;  %s24_s17 = sadd.s32 1, %s877_s17   ;;  %s1195_s12 = smov %s861_s13 }
 0x254   : > { %p21_p5 = scmp.ge.s32.totalorder %s24_s17, 4   ;;  %s1196_s13 = smov %s865_s14 }
 0x255   : > { %s1197_s14 = smov %s1009_s19  ;;  %s1198_s15 = smov %s873_s16 }
 0x256   : > { %s1199_s16 = smov %s1201_s28  ;;  %23 = sbr.rel (!%p21_p5) target bundleno = 9 (0x9), region = 94 }
 0x25b   :  { %468 = vsyncpa [#allocation3], 1 }
 0x25c   :  { %470 = vsyncpa [#allocation3 + $0x1], 1 }
 0x25d   :  { %471 = vsyncpa [#allocation6], 1 }
 0x25e   :  { %472 = vsyncpa [#allocation4], 1 }
 0x25f   :  { %474 = vsyncpa [#allocation4 + $0x1], 1 }
 0x260   :  { %475 = vsyncpa [#allocation9], 1 }
 0x261   :  { %477 = vsyncpa [#allocation9 + $0x1], 1 }

// kernel: tpu_custom_call.1
= control target key start
LH: loop header
LB: loop body
LE: loop exit
PB: predicated region body
PF: predicated region fallthrough
CT: control target
= control target key end

     0   :  { %9 = vsyncpa [#allocation3], 0  ;;  %s1178_s0 = inlined_call_operand.hbm [shape: f32[2,8,32], index: 0, kind: input, shape index: {}]   ;;  %s1179_s1 = inlined_call_operand.hbm [shape: f32[32,64], index: 1, kind: input, shape index: {}]   ;;  %s1180_s2 = inlined_call_operand.hbm [shape: f32[2,4,8,8], index: 2, kind: output, shape index: {0}]   ;;  %s1181_s3 = inlined_call_operand.hbm [shape: f32[2,4,8,8], index: 3, kind: output, shape index: {1}]  }
   0x1   :  { %11 = vsyncpa [#allocation3 + $0x1], 0 }
   0x2   :  { %12 = vsyncpa [#allocation6], 0 }
   0x3   :  { %13 = vsyncpa [#allocation4], 0 }
   0x4   :  { %15 = vsyncpa [#allocation4 + $0x1], 0 }
   0x5   :  { %16 = vsyncpa [#allocation9], 0 }
   0x6   :  { %18 = vsyncpa [#allocation9 + $0x1], 0  ;;  %s913_s12 = smov 0   ;;  %s915_s13 = smov 0  }
   0x7   :  { %s917_s14 = smov 0   ;;  %s919_s15 = smov 0  }
   0x8   :  { %s921_s16 = smov 0   ;;  %s923_s17 = smov 0  }
   0x9 LB: > { %s566_s18 = sadd.s32 4294967295, %s877_s17   ;;  %s567_s19 = sadd.s32 4294967294, %s877_s17   ;;  %s877_s17 = sphi %s923_s17, %s24_s17   ;;  %s873_s16 = sphi %s921_s16, %s1199_s16   ;;  %s869_s15 = sphi %s919_s15, %s1198_s15   ;;  %s865_s14 = sphi %s917_s14, %s1197_s14   ;;  %s861_s13 = sphi %s915_s13, %s1196_s13   ;;  %s857_s12 = sphi %s913_s12, %s1195_s12  }
   0xa   : > { %p58_p0 = scmp.ne.s32.totalorder %s861_s13, %s857_s12  ;;  %p947_p1 = scmp.eq.s32.totalorder %s566_s18, 0 }
   0xb   : > { %p951_p2 = scmp.eq.s32.totalorder %s566_s18, 1  ;;  %p111_p3 = scmp.eq.s32.totalorder %s567_s19, 1 }
   0xc   : > { %p957_p4 = por %p947_p1, %p58_p0  ;;  %p568_p5 = scmp.ge.s32.totalorder %s877_s17, 1 }
   0xd   : > { %p962_p6 = por %p111_p3, %p58_p0  ;;  %p146_p7 = scmp.lt.s32.totalorder %s877_s17, 3 }
   0xe   : > { %s1185_s22 = scalar_select %p957_p4, 1, 0 }
   0xf   : > { %s1186_s23 = scalar_select %p962_p6, 1, 0 }
  0x10   : > { %p967_p8 = pnand %p568_p5, %p146_p7  ;;  %s879_s25 = smov [#allocation5]  }
  0x11   : > { %s158_s26 = sshll.u32 %s879_s25, 4  ;;  %s36_s28 = sadd.s32 1, %s873_s16  ;;  %s159_s26 = int_to_ptr.vmem [resolvable:$true] %s158_s26 }
  0x12   : > { %p615_p9 = pneg %p967_p8  ;;  %s720_s29 = scalar_lea.vmem %s159_s26, 512 }
  0x13   : > { %p721_p13 = scmp.ne.s32.totalorder %s159_s26, %s720_s29  ;;  %p728_p5 = scmp.lt.s32.totalorder %s159_s26, %s159_s26 }
  0x14   : > { %p976_p11 = pnand %p615_p9, %p947_p1  ;;  %p729_p7 = scmp.lt.s32.totalorder %s720_s29, %s720_s29 }
  0x16   : > { %p711_p12 = pneg %p976_p11  ;;  %p730_p6 = por %p729_p7, %p728_p5 }
  0x18   : > { %p723_p0 = pnand %p721_p13, %p711_p12 }
  0x1a   : > { %p724_p3 = pneg %p723_p0 }
  0x1c   : > { %p731_p4 = pnand %p730_p6, %p724_p3 }
  0x1e   : > { %734 = shalt.err (!%p731_p4)
}
  0x1f   : > { %s880_s30 = smov 128   ;;  %s881_s4 = smov 8  }
  0x20   : > { %618 = dma.hbm_to_vmem [thread:$0]  (!%p976_p11), %s1179_s1, 512, %s159_s26, [#allocation6], %s880_s30, %s880_s30, %s881_s4  }
  0x21   : > { %p38_p6 = scmp.ge.s32.totalorder %s36_s28, 2  ;;  %s45_s7 = sadd.s32 1, %s865_s14 }
  0x22   : > { %p52_p4 = scmp.ne.s32.totalorder %s865_s14, %s861_s13  ;;  %p53_p9 = scmp.eq.s32.totalorder %s877_s17, 0 }
  0x23   : > { %s1201_s28 = smov (%p38_p6, %s36_s28), 0  ;;  %p631_p0 = scmp.lt.s32.totalorder %s877_s17, 2 }
  0x24   : > { %p994_p12 = por %p53_p9, %p52_p4  ;;  %p1000_p13 = por %p951_p2, %p52_p4 }
  0x25   : > { %s40_s10 = ssub.s32 %s873_s16, %s1201_s28  ;;  %s172_s11 = sand.u32 1, %s865_s14  }
  0x26   : > { %p43_p11 = scmp.eq.s32.totalorder %s40_s10, 0  ;;  %s571_s18 = sshll.u32 %s172_s11, 3 }
  0x27   : > { %s572_s25 = sshll.u32 %s873_s16, 7  ;;  %s176_s30 = scalar_lea.vmem [#allocation2], %s571_s18 }
  0x28   : > { %s1009_s19 = scalar_select %p43_p11, %s865_s14, %s45_s7  }
  0x29   : > { %s182_s29 = scalar_lea.hbm %s1178_s0, %s572_s25  ;;  %s184_s4 = sshll.u32 %s176_s30, 4  ;;  %s185_s4 = int_to_ptr.vmem [resolvable:$true] %s184_s4 }
  0x2a   : > { %p1017_p2 = pnand %p631_p0, %p994_p12  ;;  %s173_s5 = scalar_lea.sflag [#allocation3], %s172_s11 }
  0x2b   : > { %s748_s6 = scalar_lea.vmem %s185_s4, 128  ;;  %s882_s7 = smov [#allocation2]  }
  0x2c   : > { %p737_p3 = pneg %p1017_p2  ;;  %p749_p5 = scmp.ne.s32.totalorder %s185_s4, %s748_s6 }
  0x2d   : > { %s753_s10 = sshll.u32 %s882_s7, 4  ;;  %s754_s10 = int_to_ptr.vmem [resolvable:$false] %s753_s10 }
  0x2e   : > { %p751_p7 = pnand %p749_p5, %p737_p3  ;;  %s755_s25 = scalar_lea.vmem %s754_s10, 256 }
  0x2f   : > { %p756_p4 = scmp.lt.s32.totalorder %s185_s4, %s754_s10  ;;  %p757_p9 = scmp.lt.s32.totalorder %s755_s25, %s748_s6 }
  0x30   : > { %p752_p6 = pneg %p751_p7 }
  0x31   : > { %p758_p11 = por %p757_p9, %p756_p4 }
  0x33   : > { %p759_p10 = pnand %p758_p11, %p752_p6 }
  0x35   : > { %762 = shalt.err (!%p759_p10)
}
  0x36   : > { %622 = dma.hbm_to_vmem [thread:$0]  (!%p1017_p2), %s182_s29, 128, %s185_s4, %s173_s5  }
  0x37   : > { %193 = sbr.rel (%p967_p8) target bundleno = 585 (0x249), region = 28  ;;  %s1028_s8 = sand.u32 (!%p967_p8), 1, %s861_s13  }
  0x38   : > { %s574_s11 = sshll.u32 (!%p967_p8), %s1028_s8, 3  ;;  %s196_s18 = scalar_lea.sflag (!%p967_p8), [#allocation3], %s1028_s8 }
  0x39   : > { %s199_s26 = scalar_lea.vmem (!%p967_p8), [#allocation2], %s574_s11  ;;  %p1192_p12 = scmp.ne.s32.totalorder (!%p967_p8), %s1185_s22, 0 }
  0x3c   : > { %840 = dma.done.wait (%p1192_p12), %s196_s18, 128  }
  0x3d   : > { %842 = vsyncadd (%p1192_p12), %s196_s18, 4294967168 }
  0x3e   : > { %844 = dma.done.wait (%p947_p1), [#allocation6], 512  }
  0x3f   : > { %846 = vsyncadd (%p947_p1), [#allocation6], 4294966784  ;;  %v883_v0 = vmov 0.0   ;;  %vm884_vm0 = vmmov 0   ;;  %v235_v1 = vld [vmem:[#allocation5 + $0x18] sm:$0xff]  ;;  %v234_v2 = vld [vmem:[#allocation5 + $0x10] sm:$0xff] }
  0x40   : > { %594 = vmatprep.subr.mxu0 %v883_v0  ;;  %602 = vmatprep.mubr.msk.f32.mxu0 %vm884_vm0, %v883_v0  ;;  %v233_v3 = vld [vmem:[#allocation5 + $0x8] sm:$0xff]  ;;  %v232_v4 = vld [vmem:[#allocation5] sm:$0xff]  ;;  %v231_v5 = vld [vmem:[%s199_s26] sm:$0xff]  ;;  %vm236_vm1 = vcmask 261120   ;;  %s885_s20 = smov 104   ;;  %s886_s22 = smov 120  }
  0x41   : > { %595 = vmatpush3.msra.mxu0 %v235_v1  ;;  %s887_s24 = smov 112   ;;  %vm324_vm2 = vcmask 64512   ;;  %s888_s27 = smov 96  }
  0x42   : > { %596 = vmatprep.subr.mxu0 %v883_v0  ;;  %s576_s29 = sshll.u32 %s1028_s8, 5  ;;  %s587_s5 = sshll.u32 %s869_s15, 9 }
  0x43   : > { %597 = vmatpush3.msra.mxu0 %v234_v2  ;;  %s1060_s30 = scalar_lea.vmem [#allocation7], %s576_s29  ;;  %s230_s4 = scalar_lea.vmem [#allocation8], %s576_s29 }
  0x44   : > { %598 = vmatprep.subr.mxu0 %v883_v0  ;;  %s438_s21 = sshll.u32 %s230_s4, 4  ;;  %s1078_s10 = scalar_lea.hbm %s1181_s3, %s587_s5  ;;  %s1069_s21 = int_to_ptr.vmem [resolvable:$true] %s438_s21 }
  0x45   : > { %599 = vmatpush3.msra.mxu0 %v233_v3  ;;  %s407_s25 = scalar_lea.sflag [#allocation9], %s1028_s8  ;;  %s763_s11 = scalar_lea.vmem %s1069_s21, 512 }
  0x46   : > { %600 = vmatprep.subr.mxu0 %v883_v0  ;;  %p764_p1 = scmp.ne.s32.totalorder %s1069_s21, %s763_s11  ;;  %s889_s18 = smov [#allocation8]  }
  0x47   : > { %601 = vmatpush3.msra.mxu0 %v232_v4  ;;  %s767_s26 = sshll.u32 %s889_s18, 4  ;;  %s768_s26 = int_to_ptr.vmem [resolvable:$false] %s767_s26 }
  0x48   : > { %603 = vmatmul.mubr.msk.f32.vlgmr.msra.gmra.mxu0 %vm236_vm1, %v231_v5  ;;  %p765_p8 = pnand %p764_p1, %p1000_p13  ;;  %p770_p0 = scmp.lt.s32.totalorder %s1069_s21, %s768_s26 }
  0x4a   : > { %p766_p10 = pneg %p765_p8 }
 0x108   : > { %v306_v6 = vpop.f32.mrf.mxu0 }
 0x109   : > { %317 = vrot.lane.b32.xlu1 %v306_v6, %s885_s20  ;;  %311 = vrot.lane.b32.xlu0 %v306_v6, %s886_s22  ;;  %v320_v8 = vmul.f32 %v306_v6, %v306_v6  ;;  %s769_s20 = scalar_lea.vmem %s768_s26, 1024 }
 0x10a   : > { %v604_v7 = vpop.f32.mrf.mxu0  ;;  %p771_p2 = scmp.lt.s32.totalorder %s769_s20, %s763_s11 }
 0x10b   : > { %v325_v9 = vsel %vm324_vm2, %v320_v8, 0.0 }
 0x10c   : > { %p772_p3 = por %p771_p2, %p770_p0 }
 0x10d   : > { %314 = vrot.lane.b32.xlu0 %v306_v6, %s887_s24 }
 0x10e   : > { %p773_p5 = pnand %p772_p3, %p766_p10 }
 0x12d   : > { %326 = vadd.xlane.f32.xlu1 %v325_v9 }
 0x17b   : > { %v1041_v10 = vpop.permute.xlu1 %317  ;;  %v1043_v11 = vpop.permute.xlu0 %311 }
 0x17c   : > { %v321_v12 = vmul.f32 %v1043_v11, %v1043_v11  ;;  %v323_v13 = vmul.f32 %v1041_v10, %v1041_v10 }
 0x17e   : > { %v328_v14 = vsel %vm324_vm2, %v321_v12, 0.0  ;;  %v334_v15 = vsel %vm324_vm2, %v323_v13, 0.0 }
 0x17f   : > { %329 = vadd.xlane.f32.xlu0 %v328_v14  ;;  %v1051_v16 = vpop.permute.xlu0 %314  ;;  %335 = vadd.xlane.f32.xlu1 %v334_v15 }
 0x180   : > { %v322_v17 = vmul.f32 %v1051_v16, %v1051_v16 }
 0x182   : > { %v331_v18 = vsel %vm324_vm2, %v322_v17, 0.0 }
 0x183   : > { %332 = vadd.xlane.f32.xlu0 %v331_v18 }
 0x190   : > { %387 = vrot.lane.b32.xlu1 %v1043_v11, %s888_s27 }
 0x194   : > { %389 = vrot.lane.b32.xlu1 %v1051_v16, %s888_s27 }
 0x199   : > { %385 = vrot.lane.b32.xlu0 %v306_v6, %s888_s27 }
 0x19d   : > { %391 = vrot.lane.b32.xlu0 %v1041_v10, %s888_s27 }
 0x1b6   : > { %v327_v19 = vpop.xlane.xlu1 %326 }
 0x1b7   : > { %693 = vrsqrt.f32 %v327_v19  ;;  %vm339_vm3 = vcmp.eq.f32.partialorder %v327_v19, inf  ;;  %v342_v22 = vand.u32 2147483648, %v327_v19  ;;  %vm341_vm4 = vcmp.eq.f32.partialorder %v327_v19, 0.0 }
 0x1c4   : > { %v694_v20 = vpop.eup %693 }
 0x1c5   : > { %v338_v21 = vmul.f32 %v694_v20, %v327_v19 }
 0x1c7   : > { %v340_v23 = vsel %vm339_vm3, %v327_v19, %v338_v21 }
 0x1c8   : > { %v343_v24 = vsel %vm341_vm4, %v342_v22, %v340_v23 }
 0x1c9   : > { %v365_v25 = vmul.f32 0.35355338, %v343_v24 }
 0x1cb   : > { %v369_v26 = vadd.f32 0.0001, %v365_v25 }
 0x1cd   : > { %695 = vrcp.f32 %v369_v26 }
 0x1da   : > { %v696_v27 = vpop.eup %695 }
 0x1db   : > { %v374_v28 = vmul.f32 %v696_v27, %v306_v6 }
 0x1dd   : > { %381 = vst.msk [vmem:[%s1060_s30] sm:$0xff] %vm324_vm2, %v374_v28 }
 0x208   : > { %v330_v29 = vpop.xlane.xlu0 %329  ;;  %v336_v30 = vpop.xlane.xlu1 %335 }
 0x209   : > { %697 = vrsqrt.f32 %v330_v29 }
 0x20a   : > { %699 = vrsqrt.f32 %v336_v30 }
 0x20c   : > { %v1064_v31 = vpop.xlane.xlu0 %332  ;;  %v388_v32 = vpop.permute.xlu1 %387 }
 0x20d   : > { %701 = vrsqrt.f32 %v1064_v31  ;;  %398 = vst.msk [vmem:[%s230_s4 + $0x8] sm:$0xff] %vm324_vm2, %v388_v32 }
 0x210   : > { %v386_v33 = vpop.permute.xlu0 %385  ;;  %v390_v34 = vpop.permute.xlu1 %389 }
 0x211   : > { %397 = vst.msk [vmem:[%s230_s4] sm:$0xff] %vm324_vm2, %v386_v33  ;;  %399 = vst.msk [vmem:[%s230_s4 + $0x10] sm:$0xff] %vm324_vm2, %v390_v34 }
 0x214   : > { %v392_v35 = vpop.permute.xlu0 %391 }
 0x215   : > { %400 = vst.msk [vmem:[%s230_s4 + $0x18] sm:$0xff] %vm324_vm2, %v392_v35 }
 0x216   : > { %v698_v36 = vpop.eup %697 }
 0x217   : > { %776 = shalt.err (!%p773_p5)
}
 0x218   : > { %s777_s22 = scalar_lea.hbm %s1078_s10, 512  ;;  %s781_s29 = scalar_lea.hbm %s1181_s3, 1024 }
 0x219   : > { %p778_p7 = scmp.ne.s32.totalorder %s1078_s10, %s777_s22  ;;  %p782_p9 = scmp.lt.s32.totalorder %s1078_s10, %s1181_s3 }
 0x21a   : > { %p783_p11 = scmp.lt.s32.totalorder %s781_s29, %s777_s22 }
 0x21b   : > { %p779_p6 = pnand %p778_p7, %p1000_p13 }
 0x21c   : > { %p784_p12 = por %p783_p11, %p782_p9 }
 0x21d   : > { %p780_p4 = pneg %p779_p6 }
 0x21f   : > { %p785_p1 = pnand %p784_p12, %p780_p4 }
 0x221   : > { %788 = shalt.err (!%p785_p1)
}
 0x222   : > { %s890_s7 = smov 128   ;;  %s891_s11 = smov 8   ;;  %v700_v37 = vpop.eup %699  ;;  %v345_v38 = vmul.f32 %v698_v36, %v330_v29  ;;  %vm346_vm5 = vcmp.eq.f32.partialorder %v330_v29, inf  ;;  %v349_v39 = vand.u32 2147483648, %v330_v29  ;;  %vm348_vm6 = vcmp.eq.f32.partialorder %v330_v29, 0.0 }
 0x223   : > { %612 = dma.vmem_to_hbm [thread:$0]  (%p1000_p13), %s1069_s21, 512, %s1078_s10, %s407_s25, %s890_s7, %s890_s7, %s891_s11   ;;  %v359_v40 = vmul.f32 %v700_v37, %v336_v30  ;;  %vm360_vm7 = vcmp.eq.f32.partialorder %v336_v30, inf  ;;  %v363_v42 = vand.u32 2147483648, %v336_v30  ;;  %v702_v43 = vpop.eup %701  ;;  %vm362_vm8 = vcmp.eq.f32.partialorder %v336_v30, 0.0 }
 0x224   : > { %v347_v41 = vsel %vm346_vm5, %v330_v29, %v345_v38  ;;  %v352_v48 = vmul.f32 %v702_v43, %v1064_v31  ;;  %vm353_vm9 = vcmp.eq.f32.partialorder %v1064_v31, inf  ;;  %v356_v50 = vand.u32 2147483648, %v1064_v31  ;;  %s421_s21 = sshll.u32 %s1060_s30, 4  ;;  %s1127_s18 = scalar_lea.hbm %s1180_s2, %s587_s5  ;;  %s1119_s21 = int_to_ptr.vmem [resolvable:$true] %s421_s21 }
 0x225   : > { %v350_v44 = vsel %vm348_vm6, %v349_v39, %v347_v41  ;;  %v361_v45 = vsel %vm360_vm7, %v336_v30, %v359_v40  ;;  %vm355_vm10 = vcmp.eq.f32.partialorder %v1064_v31, 0.0  ;;  %s402_s26 = scalar_lea.sflag [#allocation4], %s1028_s8  ;;  %s789_s20 = scalar_lea.vmem %s1119_s21, 512 }
 0x226   : > { %v366_v46 = vmul.f32 0.35355338, %v350_v44  ;;  %v364_v47 = vsel %vm362_vm8, %v363_v42, %v361_v45  ;;  %v354_v52 = vsel %vm353_vm9, %v1064_v31, %v352_v48  ;;  %p790_p8 = scmp.ne.s32.totalorder %s1119_s21, %s789_s20  ;;  %s892_s22 = smov [#allocation7]  }
 0x227   : > { %v368_v49 = vmul.f32 0.35355338, %v364_v47  ;;  %v357_v54 = vsel %vm355_vm10, %v356_v50, %v354_v52  ;;  %s793_s24 = sshll.u32 %s892_s22, 4  ;;  %s794_s24 = int_to_ptr.vmem [resolvable:$false] %s793_s24 }
 0x228   : > { %v370_v51 = vadd.f32 0.0001, %v366_v46  ;;  %v367_v55 = vmul.f32 0.35355338, %v357_v54  ;;  %p791_p10 = pnand %p790_p8, %p1000_p13  ;;  %s795_s27 = scalar_lea.vmem %s794_s24, 1024 }
 0x229   : > { %v372_v53 = vadd.f32 0.0001, %v368_v49  ;;  %p796_p2 = scmp.lt.s32.totalorder %s1119_s21, %s794_s24  ;;  %p797_p3 = scmp.lt.s32.totalorder %s795_s27, %s789_s20 }
 0x22a   : > { %703 = vrcp.f32 %v370_v51  ;;  %v371_v56 = vadd.f32 0.0001, %v367_v55  ;;  %p792_p0 = pneg %p791_p10 }
 0x22b   : > { %705 = vrcp.f32 %v372_v53  ;;  %p798_p5 = por %p797_p3, %p796_p2 }
 0x22c   : > { %707 = vrcp.f32 %v371_v56 }
 0x22d   : > { %p799_p7 = pnand %p798_p5, %p792_p0 }
 0x237   : > { %v704_v57 = vpop.eup %703 }
 0x238   : > { %v706_v58 = vpop.eup %705  ;;  %v376_v59 = vmul.f32 %v704_v57, %v1043_v11 }
 0x239   : > { %v380_v60 = vmul.f32 %v706_v58, %v1041_v10  ;;  %v708_v61 = vpop.eup %707 }
 0x23a   : > { %382 = vst.msk [vmem:[%s1060_s30 + $0x8] sm:$0xff] %vm324_vm2, %v376_v59  ;;  %v378_v62 = vmul.f32 %v708_v61, %v1051_v16 }
 0x23b   : > { %384 = vst.msk [vmem:[%s1060_s30 + $0x18] sm:$0xff] %vm324_vm2, %v380_v60 }
 0x23c   : > { %383 = vst.msk [vmem:[%s1060_s30 + $0x10] sm:$0xff] %vm324_vm2, %v378_v62 }
 0x23d   : > { %802 = shalt.err (!%p799_p7)
}
 0x23e   : > { %s803_s15 = scalar_lea.hbm %s1127_s18, 512  ;;  %s807_s5 = scalar_lea.hbm %s1180_s2, 1024 }
 0x23f   : > { %p804_p6 = scmp.ne.s32.totalorder %s1127_s18, %s803_s15  ;;  %p808_p11 = scmp.lt.s32.totalorder %s1127_s18, %s1180_s2 }
 0x240   : > { %p809_p12 = scmp.lt.s32.totalorder %s807_s5, %s803_s15 }
 0x241   : > { %p805_p4 = pnand %p804_p6, %p1000_p13 }
 0x242   : > { %p810_p1 = por %p809_p12, %p808_p11 }
 0x243   : > { %p806_p9 = pneg %p805_p4 }
 0x245   : > { %p811_p8 = pnand %p810_p1, %p806_p9 }
 0x247   : > { %814 = shalt.err (!%p811_p8)
}
 0x248   : > { %611 = dma.vmem_to_hbm [thread:$0]  (%p1000_p13), %s1119_s21, 512, %s1127_s18, %s402_s26, %s890_s7, %s890_s7, %s891_s11  }
 0x249 PF: > { %s453_s6 = sand.u32 1, %s857_s12   ;;  %p1193_p10 = scmp.ne.s32.totalorder %s1186_s23, 0 }
 0x24a   : > { %p1194_p0 = scmp.ge.s32.totalorder %s877_s17, 2  ;;  %s454_s10 = scalar_lea.sflag [#allocation4], %s453_s6 }
 0x24c   : > { %p624_p2 = pnand %p1194_p0, %p1193_p10 }
 0x24e   : > { %p625_p3 = pneg %p624_p2 }
 0x250   : > { %848 = dma.done.wait (%p625_p3), %s454_s10, 512  }
 0x251   : > { %850 = vsyncadd (%p625_p3), %s454_s10, 4294966784  ;;  %s463_s25 = scalar_lea.sflag [#allocation9], %s453_s6 }
 0x252   : > { %852 = dma.done.wait (%p625_p3), %s463_s25, 512  }
 0x253   : > { %854 = vsyncadd (%p625_p3), %s463_s25, 4294966784  ;;  %s24_s17 = sadd.s32 1, %s877_s17   ;;  %s1195_s12 = smov %s861_s13 }
 0x254   : > { %p21_p5 = scmp.ge.s32.totalorder %s24_s17, 4   ;;  %s1196_s13 = smov %s865_s14 }
 0x255   : > { %s1197_s14 = smov %s1009_s19  ;;  %s1198_s15 = smov %s873_s16 }
 0x256   : > { %s1199_s16 = smov %s1201_s28  ;;  %23 = sbr.rel (!%p21_p5) target bundleno = 9 (0x9), region = 94 }
 0x25b   :  { %468 = vsyncpa [#allocation3], 1 }
 0x25c   :  { %470 = vsyncpa [#allocation3 + $0x1], 1 }
 0x25d   :  { %471 = vsyncpa [#allocation6], 1 }
 0x25e   :  { %472 = vsyncpa [#allocation4], 1 }
 0x25f   :  { %474 = vsyncpa [#allocation4 + $0x1], 1 }
 0x260   :  { %475 = vsyncpa [#allocation9], 1 }
 0x261   :  { %477 = vsyncpa [#allocation9 + $0x1], 1 }

</bundles_post_ra>
